<compile_context>
chip_gen: v6e
topology: v6e:2x2x1
jax: 0.10.0
libtpu: 0.0.40
codegen_flags: <defaults>
</compile_context>

<pallas_src>
import functools
import math

import jax
import jax.numpy as jnp
from jax import lax
from jax.experimental import pallas as pl
from jax.experimental.pallas import tpu as pltpu


def _full_spec(shape):
    """BlockSpec covering the whole array as a single block."""
    nd = len(shape)
    return pl.BlockSpec(shape, lambda i: (0,) * nd)


# ----------------------------- embedding kernel -----------------------------

def _embed_kernel(coord_ref, w_ref, fe_ref, pe_ref, o_ref):
    # coord Linear (bias=False) fused with the concat of the two embedding
    # gathers: h = cat(coord @ W, feat_embed[flag], feat_embed[pos]).
    ce = jnp.dot(coord_ref[...].astype(jnp.bfloat16), w_ref[...],
                 preferred_element_type=jnp.float32)                 # (M, E)
    o_ref[...] = jnp.concatenate([ce, fe_ref[...], pe_ref[...]],
                                 axis=1).astype(o_ref.dtype)


def pallas_embed(coord_flat, w_coord, fe_flat, pe_flat):
    M, Ci = coord_flat.shape
    E = w_coord.shape[1]
    return pl.pallas_call(
        _embed_kernel,
        grid=(1,),
        in_specs=[_full_spec((M, Ci)), _full_spec((Ci, E)),
                  _full_spec((M, E)), _full_spec((M, E))],
        out_specs=_full_spec((M, 3 * E)),
        out_shape=jax.ShapeDtypeStruct((M, 3 * E), jnp.float32),
    )(coord_flat, w_coord, fe_flat, pe_flat)


# ------------------------ fused transformer layer ---------------------------

def _layer_kernel(x_ref, wqkv_ref, wo_ref,
                  bn1g_ref, bn1b_ref,
                  ffw1_ref, ffb1_ref, ffw2_ref, ffb2_ref,
                  bn2g_ref, bn2b_ref,
                  o_ref, *, B, N, H, d, eps):
    D = H * d
    x = x_ref[...]                                                   # (M, D) f32
    scale = 1.0 / math.sqrt(d)

    # Fused Q|K|V projection: one (M, D) x (D, 3D) MXU matmul (bf16 in, f32 acc).
    qkv = jnp.dot(x.astype(jnp.bfloat16), wqkv_ref[...],
                  preferred_element_type=jnp.float32)                # (M, 3D)

    # Multi-head attention fully in VMEM.  B and H are tiny static constants,
    # so the Python loops unroll at trace time (no grid steps, no HBM traffic).
    wo = wo_ref[...]                                                 # (D, D) bf16
    batch_rows = []
    for b in range(B):
        r0 = b * N
        heads = []
        for h in range(H):
            c = h * d
            q = qkv[r0:r0 + N, c:c + d].astype(jnp.bfloat16)             # (N, d)
            k = qkv[r0:r0 + N, D + c:D + c + d].astype(jnp.bfloat16)     # (N, d)
            v = qkv[r0:r0 + N, 2 * D + c:2 * D + c + d].astype(jnp.bfloat16)
            # scores = q @ k^T via dot_general (contract last dims, no k.T).
            s = lax.dot_general(q, k, (((1,), (1,)), ((), ())),
                                preferred_element_type=jnp.float32) * scale
            m = jnp.max(s, axis=-1, keepdims=True)
            p = jnp.exp(s - m)
            p = p * pl.reciprocal(jnp.sum(p, axis=-1, keepdims=True),
                                  approx=True)
            heads.append(jnp.dot(p.astype(jnp.bfloat16), v,
                                 preferred_element_type=jnp.float32))    # (N, d)
        heads_cat = jnp.concatenate(heads, axis=1).astype(jnp.bfloat16)  # (N, D)
        batch_rows.append(jnp.dot(heads_cat, wo,
                                  preferred_element_type=jnp.float32))   # (N, D)
    mha = jnp.concatenate(batch_rows, axis=0)                        # (M, D)

    # Residual + BatchNorm (training-style batch statistics over B*N rows).
    y = x + mha
    mean = jnp.mean(y, axis=0, keepdims=True)
    var = jnp.mean(jnp.square(y - mean), axis=0, keepdims=True)
    y = (y - mean) * lax.rsqrt(var + eps) * bn1g_ref[...] + bn1b_ref[...]

    # Position-wise feed-forward (ReLU), fused in the same kernel.
    f = jnp.dot(y.astype(jnp.bfloat16), ffw1_ref[...],
                preferred_element_type=jnp.float32) + ffb1_ref[...]
    f = jnp.maximum(f, 0.0)
    f = jnp.dot(f.astype(jnp.bfloat16), ffw2_ref[...],
                preferred_element_type=jnp.float32) + ffb2_ref[...]

    # Residual + BatchNorm.
    z = y + f
    mean2 = jnp.mean(z, axis=0, keepdims=True)
    var2 = jnp.mean(jnp.square(z - mean2), axis=0, keepdims=True)
    z = (z - mean2) * lax.rsqrt(var2 + eps) * bn2g_ref[...] + bn2b_ref[...]

    o_ref[...] = z.astype(o_ref.dtype)


def pallas_transformer_layer(x_flat, layer, *, B, N, n_heads, eps=1e-5):
    M, D = x_flat.shape
    H = n_heads
    d = D // H
    F = layer["ff_w1"].shape[1]
    kernel = functools.partial(_layer_kernel, B=B, N=N, H=H, d=d, eps=eps)
    return pl.pallas_call(
        kernel,
        grid=(1,),
        in_specs=[_full_spec((M, D)),
                  _full_spec((D, 3 * D)), _full_spec((D, D)),
                  _full_spec((1, D)), _full_spec((1, D)),
                  _full_spec((D, F)), _full_spec((1, F)),
                  _full_spec((F, D)), _full_spec((1, D)),
                  _full_spec((1, D)), _full_spec((1, D))],
        out_specs=_full_spec((M, D)),
        out_shape=jax.ShapeDtypeStruct((M, D), jnp.float32),
        compiler_params=pltpu.CompilerParams(
            dimension_semantics=("arbitrary",)),
    )(x_flat, layer["w_qkv"], layer["w_o"],
      layer["bn1_g"], layer["bn1_b"],
      layer["ff_w1"], layer["ff_b1"], layer["ff_w2"], layer["ff_b2"],
      layer["bn2_g"], layer["bn2_b"])


# --------------------- fused seq-sum + MLP classifier -----------------------

def _head_kernel(h_ref, w1_ref, b1_ref, w2_ref, b2_ref, w3_ref, b3_ref,
                 o_ref, *, B, N):
    h = h_ref[...]                                                   # (M, D)
    # Sum over the sequence dimension, per batch (rows b*N : (b+1)*N).
    g = jnp.concatenate(
        [jnp.sum(h[b * N:(b + 1) * N, :], axis=0, keepdims=True)
         for b in range(B)], axis=0)                                 # (B, D)
    z = jnp.dot(g.astype(jnp.bfloat16), w1_ref[...],
                preferred_element_type=jnp.float32) + b1_ref[...]
    z = jnp.maximum(z, 0.0)
    z = jnp.dot(z.astype(jnp.bfloat16), w2_ref[...],
                preferred_element_type=jnp.float32) + b2_ref[...]
    z = jnp.maximum(z, 0.0)
    z = jnp.dot(z.astype(jnp.bfloat16), w3_ref[...],
                preferred_element_type=jnp.float32) + b3_ref[...]
    o_ref[...] = z.astype(o_ref.dtype)


def pallas_head(h_flat, params, *, B, N):
    M, D = h_flat.shape
    F = params["mlp_w1"].shape[1]
    C = params["mlp_w3"].shape[1]
    kernel = functools.partial(_head_kernel, B=B, N=N)
    return pl.pallas_call(
        kernel,
        grid=(1,),
        in_specs=[_full_spec((M, D)),
                  _full_spec((D, F)), _full_spec((1, F)),
                  _full_spec((F, F)), _full_spec((1, F)),
                  _full_spec((F, C)), _full_spec((1, C))],
        out_specs=_full_spec((B, C)),
        out_shape=jax.ShapeDtypeStruct((B, C), jnp.float32),
    )(h_flat, params["mlp_w1"], params["mlp_b1"],
      params["mlp_w2"], params["mlp_b2"],
      params["mlp_w3"], params["mlp_b3"])


# ----------------------------- params & forward -----------------------------

def init_params(key, *, coord_input_dim, feat_dict_size, n_layers, n_heads,
                embed_dim, feedforward_dim, n_classes):
    model_dim = embed_dim * 3
    assert model_dim % n_heads == 0
    keys = iter(jax.random.split(key, 2 + 4 * n_layers + 3))

    def dense(shape, fan_in):
        # MXU-operand weights are stored in bfloat16; kernels accumulate in f32.
        w = jax.random.normal(next(keys), shape, jnp.float32) / math.sqrt(fan_in)
        return w.astype(jnp.bfloat16)

    D, F = model_dim, feedforward_dim
    params = {
        "n_heads": n_heads,
        "coord_embed_w": dense((coord_input_dim, embed_dim), coord_input_dim),
        "feat_embed": jax.random.normal(next(keys), (feat_dict_size, embed_dim),
                                        jnp.float32) * 0.1,
        "layers": [],
    }
    for _ in range(n_layers):
        params["layers"].append({
            "w_qkv": dense((D, 3 * D), D),   # fused Q|K|V projection weight
            "w_o": dense((D, D), D),
            "bn1_g": jnp.ones((1, D), jnp.float32),
            "bn1_b": jnp.zeros((1, D), jnp.float32),
            "ff_w1": dense((D, F), D),
            "ff_b1": jnp.zeros((1, F), jnp.float32),
            "ff_w2": dense((F, D), F),
            "ff_b2": jnp.zeros((1, D), jnp.float32),
            "bn2_g": jnp.ones((1, D), jnp.float32),
            "bn2_b": jnp.zeros((1, D), jnp.float32),
        })
    params["mlp_w1"] = dense((D, F), D)
    params["mlp_b1"] = jnp.zeros((1, F), jnp.float32)
    params["mlp_w2"] = dense((F, F), F)
    params["mlp_b2"] = jnp.zeros((1, F), jnp.float32)
    params["mlp_w3"] = dense((F, n_classes), F)
    params["mlp_b3"] = jnp.zeros((1, n_classes), jnp.float32)
    return params


def vanilla_transformer_forward(params, coord, flag, pos,
                                attention_mask=None, padding_mask=None):
    # TODO(synk): attention_mask inside the softmax is not implemented
    # (only the mask=None path of the original module is supported).
    B, N, Ci = coord.shape
    M = B * N

    # Embedding-table lookups stay as XLA gathers; coord Linear + concat are
    # fused into one Pallas kernel.
    fe = jnp.take(params["feat_embed"], flag.reshape(M), axis=0)     # (M, E)
    pe = jnp.take(params["feat_embed"], pos.reshape(M), axis=0)      # (M, E)
    h = pallas_embed(coord.reshape(M, Ci).astype(jnp.float32),
                     params["coord_embed_w"], fe, pe)                # (M, 3E)

    for layer in params["layers"]:
        h = pallas_transformer_layer(h, layer, B=B, N=N,
                                     n_heads=params["n_heads"])

    if padding_mask is not None:
        # TODO(synk): could be fused into the head kernel; None path used here.
        h = h * padding_mask.reshape(M, -1).astype(h.dtype)

    logits = pallas_head(h, params, B=B, N=N)                        # (B, C)
    return logits


if __name__ == "__main__":
    # Small shapes consistent with the module's forward.
    B, N = 2, 8
    coord_input_dim = 2
    feat_dict_size = 104
    n_layers = 2
    n_heads = 4
    embed_dim = 32          # model_dim = 3 * embed_dim = 96, head_dim = 24
    feedforward_dim = 64
    n_classes = 16

    key = jax.random.PRNGKey(0)
    pkey, ckey, fkey, poskey = jax.random.split(key, 4)

    params = init_params(
        pkey,
        coord_input_dim=coord_input_dim,
        feat_dict_size=feat_dict_size,
        n_layers=n_layers,
        n_heads=n_heads,
        embed_dim=embed_dim,
        feedforward_dim=feedforward_dim,
        n_classes=n_classes,
    )

    coord = jax.random.normal(ckey, (B, N, coord_input_dim), jnp.float32)
    flag = jax.random.randint(fkey, (B, N), 0, feat_dict_size)
    pos = jax.random.randint(poskey, (B, N), 0, feat_dict_size)

    logits = vanilla_transformer_forward(params, coord, flag, pos)
    logits = jax.block_until_ready(logits)
    assert logits.shape == (B, n_classes)
    assert bool(jnp.all(jnp.isfinite(logits)))
    print("KERNEL_OK")
</pallas_src>

<mosaic_0001>
module attributes {stable_mosaic.version = 11 : i64} {
  func.func @_embed_kernel(%arg0: i32, %arg1: memref<16x2xf32, #tpu.memory_space<vmem>>, %arg2: memref<2x32xbf16, #tpu.memory_space<vmem>>, %arg3: memref<16x32xf32, #tpu.memory_space<vmem>>, %arg4: memref<16x32xf32, #tpu.memory_space<vmem>>, %arg5: memref<16x96xf32, #tpu.memory_space<vmem>>) attributes {dimension_semantics = [#tpu.dimension_semantics<arbitrary>], iteration_bounds = array<i64: 1>, scalar_prefetch = 0 : i64, scratch_operands = 0 : i64, tpu.core_type = #tpu.core_type<tc>, window_params = [{pipeline_mode = #tpu.pipeline_mode<synchronous>, transform_indices = @transform_0, window_bounds = array<i64: 16, 2>}, {pipeline_mode = #tpu.pipeline_mode<synchronous>, transform_indices = @transform_1, window_bounds = array<i64: 2, 32>}, {pipeline_mode = #tpu.pipeline_mode<synchronous>, transform_indices = @transform_2, window_bounds = array<i64: 16, 32>}, {pipeline_mode = #tpu.pipeline_mode<synchronous>, transform_indices = @transform_3, window_bounds = array<i64: 16, 32>}, {pipeline_mode = #tpu.pipeline_mode<synchronous>, transform_indices = @transform_4, window_bounds = array<i64: 16, 96>}]} {
    %c0 = arith.constant 0 : index
    %c0_0 = arith.constant 0 : index
    %0 = vector.load %arg1[%c0, %c0_0] : memref<16x2xf32, #tpu.memory_space<vmem>>, vector<16x2xf32>
    %1 = arith.truncf %0 : vector<16x2xf32> to vector<16x2xbf16>
    %c0_1 = arith.constant 0 : index
    %c0_2 = arith.constant 0 : index
    %2 = vector.load %arg2[%c0_1, %c0_2] : memref<2x32xbf16, #tpu.memory_space<vmem>>, vector<2x32xbf16>
    %cst = arith.constant dense<0.000000e+00> : vector<16x32xf32>
    %3 = tpu.matmul %1, %2, %cst {dimension_numbers = #tpu.dot_dimension_numbers<[1], [0], [0], [1], [0, 0, 1, 1], [], []>} : vector<16x2xbf16>, vector<2x32xbf16>, vector<16x32xf32> -> vector<16x32xf32>
    %c0_3 = arith.constant 0 : index
    %c0_4 = arith.constant 0 : index
    %4 = vector.load %arg3[%c0_3, %c0_4] : memref<16x32xf32, #tpu.memory_space<vmem>>, vector<16x32xf32>
    %c0_5 = arith.constant 0 : index
    %c0_6 = arith.constant 0 : index
    %5 = vector.load %arg4[%c0_5, %c0_6] : memref<16x32xf32, #tpu.memory_space<vmem>>, vector<16x32xf32>
    %6 = tpu.concatenate %3, %4, %5 in 1 : vector<16x32xf32>, vector<16x32xf32>, vector<16x32xf32> -> vector<16x96xf32>
    %c0_7 = arith.constant 0 : index
    %c0_8 = arith.constant 0 : index
    %7 = vector.load %arg5[%c0_7, %c0_8] : memref<16x96xf32, #tpu.memory_space<vmem>>, vector<16x96xf32>
    tpu.vector_store %arg5[%c0_7, %c0_8], %6 {strides = array<i32>} : memref<16x96xf32, #tpu.memory_space<vmem>>, vector<16x96xf32>,
    return
  }
  func.func @transform_0(%arg0: i32) -> (i32, i32) {
    %c0_i32 = arith.constant 0 : i32
    %c0_i32_0 = arith.constant 0 : i32
    %c0_i32_1 = arith.constant 0 : i32
    return %c0_i32, %c0_i32_0 : i32, i32
  }
  func.func @transform_1(%arg0: i32) -> (i32, i32) {
    %c0_i32 = arith.constant 0 : i32
    %c0_i32_0 = arith.constant 0 : i32
    %c0_i32_1 = arith.constant 0 : i32
    return %c0_i32, %c0_i32_0 : i32, i32
  }
  func.func @transform_2(%arg0: i32) -> (i32, i32) {
    %c0_i32 = arith.constant 0 : i32
    %c0_i32_0 = arith.constant 0 : i32
    %c0_i32_1 = arith.constant 0 : i32
    return %c0_i32, %c0_i32_0 : i32, i32
  }
  func.func @transform_3(%arg0: i32) -> (i32, i32) {
    %c0_i32 = arith.constant 0 : i32
    %c0_i32_0 = arith.constant 0 : i32
    %c0_i32_1 = arith.constant 0 : i32
    return %c0_i32, %c0_i32_0 : i32, i32
  }
  func.func @transform_4(%arg0: i32) -> (i32, i32) {
    %c0_i32 = arith.constant 0 : i32
    %c0_i32_0 = arith.constant 0 : i32
    %c0_i32_1 = arith.constant 0 : i32
    return %c0_i32, %c0_i32_0 : i32, i32
  }
}

</mosaic_0001>

<bundles_post_ra>
// kernel: tpu_custom_call.1
= control target key start
LH: loop header
LB: loop body
LE: loop exit
PB: predicated region body
PF: predicated region fallthrough
CT: control target
= control target key end

     0   :  { %9 = vsyncpa [#allocation3], 0  ;;  %s253_s0 = inlined_call_operand.vmem [shape: f32[16,2], index: 0, kind: input, shape index: {}]   ;;  %s254_s1 = inlined_call_operand.vmem [shape: bf16[2,32], index: 1, kind: input, shape index: {}]   ;;  %s255_s2 = inlined_call_operand.vmem [shape: f32[16,32], index: 2, kind: input, shape index: {}]   ;;  %s256_s3 = inlined_call_operand.hbm [shape: f32[16,32], index: 3, kind: input, shape index: {}]   ;;  %s257_s4 = inlined_call_operand.hbm [shape: f32[16,96], index: 4, kind: output, shape index: {}]  }
   0x1   :  { %10 = vsyncpa [#allocation4], 0  ;;  %s193_s15 = smov [#allocation2]  }
   0x2   :  { %s22_s16 = sshll.u32 %s193_s15, 4  ;;  %s23_s16 = int_to_ptr.vmem [resolvable:$true] %s22_s16 }
   0x3   :  { %s157_s17 = scalar_lea.vmem %s23_s16, 256  ;;  %p162_p1 = scmp.lt.s32.totalorder %s23_s16, %s23_s16 }
   0x4   :  { %p158_p0 = scmp.ne.s32.totalorder %s23_s16, %s157_s17  ;;  %p163_p2 = scmp.lt.s32.totalorder %s157_s17, %s157_s17 }
   0x6   :  { %p164_p3 = por %p163_p2, %p162_p1 }
   0x8   :  { %p165_p4 = pnand %p164_p3, %p158_p0 }
   0xa   :  { %168 = shalt.err (!%p165_p4)
}
   0xb   :  { %s194_s18 = smov 128   ;;  %s195_s19 = smov 8  }
   0xc   :  { %28 = dma.hbm_to_vmem [thread:$0]  %s256_s3, 256, %s23_s16, [#allocation3], %s194_s18, %s194_s18, %s195_s19  }
   0xd   :  { %189 = dma.done.wait [#allocation3], 256  }
   0xe   :  { %190 = vsyncadd [#allocation3], 4294967040  ;;  %v196_v0 = vmov 0.0   ;;  %vm197_vm0 = vmmov 0   ;;  %vm41_vm1 = vcmask 1040384   ;;  %v33_v2 = vld [vmem:[%s253_s0] sm:$0xff] }
   0xf   :  { %135 = vmatprep.subr.bf16.mxu0 %v196_v0  ;;  %137 = vmatprep.mubr.msk.bf16.mxu0 %vm197_vm0, %v196_v0  ;;  %v36_v1 = vld [vmem:[%s254_s1] sm:$0x1]  ;;  %v34_v3 = vld [vmem:[%s253_s0 + $0x8] sm:$0xff]  ;;  %vm37_vm2 = vcmask 15360   ;;  %s198_s29 = smov 32   ;;  %s199_s1 = smov 64  }
  0x10   :  { %v43_v4 = vsel %vm41_vm1, %v36_v1, 0  ;;  %v35_v5 = vpack.c.bf16 %v34_v3, %v33_v2  ;;  %v86_v6 = vld [vmem:[%s255_s2] sm:$0xff]  ;;  %v87_v8 = vld [vmem:[%s255_s2 + $0x8] sm:$0xff]  ;;  %vm106_vm3 = vcmask 261120   ;;  %vm109_vm4 = vcmask 523264   ;;  %s200_s0 = smov [#allocation5]  }
  0x11   :  { %v88_v7 = vld [vmem:[#allocation2] sm:$0xff]  ;;  %136 = vmatpush3.bf16.msra.mxu0 %v43_v4  ;;  %92 = vrot.lane.b32.xlu0 %v86_v6, %s198_s29  ;;  %v89_v9 = vld [vmem:[#allocation2 + $0x8] sm:$0xff]  ;;  %vm112_vm5 = vcmask 785408   ;;  %s120_s6 = sshll.u32 %s200_s0, 4  ;;  %s121_s6 = int_to_ptr.vmem [resolvable:$true] %s120_s6 }
  0x12   :  { %100 = vrot.lane.b32.xlu1 %v88_v7, %s199_s1  ;;  %s169_s2 = scalar_lea.vmem %s121_s6, 256  ;;  %p174_p6 = scmp.lt.s32.totalorder %s121_s6, %s121_s6 }
  0x13   :  { %p170_p5 = scmp.ne.s32.totalorder %s121_s6, %s169_s2  ;;  %p175_p7 = scmp.lt.s32.totalorder %s169_s2, %s169_s2 }
  0x14   :  { %138 = vmatmul.mubr.msk.bf16.vlgmr.msra.gmra.mxu0 %vm37_vm2, %v35_v5 }
  0x15   :  { %94 = vrot.lane.b32.xlu0 %v87_v8, %s198_s29  ;;  %p176_p8 = por %p175_p7, %p174_p6 }
  0x16   :  { %102 = vrot.lane.b32.xlu1 %v89_v9, %s199_s1 }
  0x17   :  { %p177_p9 = pnand %p176_p8, %p170_p5 }
  0x83   :  { %v93_v10 = vpop.permute.xlu0 %92 }
  0x84   :  { %v101_v11 = vpop.permute.xlu1 %100 }
  0x87   :  { %v95_v16 = vpop.permute.xlu0 %94 }
  0x88   :  { %v103_v17 = vpop.permute.xlu1 %102 }
  0xd4   :  { %v79_v12 = vpop.f32.mrf.mxu0 }
  0xd5   :  { %v107_v13 = vsel %vm106_vm3, %v79_v12, %v93_v10 }
  0xd6   :  { %v110_v14 = vsel %vm109_vm4, %v107_v13, %v101_v11  ;;  %v139_v15 = vpop.f32.mrf.mxu0 }
  0xd7   :  { %113 = vst.msk [vmem:[#allocation5] sm:$0xff] %vm112_vm5, %v110_v14 }
  0xd8   :  { %v82_v18 = vpop.f32.mrf.mxu0 }
  0xd9   :  { %v108_v19 = vsel %vm106_vm3, %v82_v18, %v95_v16 }
  0xda   :  { %v111_v20 = vsel %vm109_vm4, %v108_v19, %v103_v17  ;;  %v140_v21 = vpop.f32.mrf.mxu0 }
  0xdb   :  { %114 = vst.msk [vmem:[#allocation5 + $0x8] sm:$0xff] %vm112_vm5, %v111_v20 }
  0xdc   :  { %180 = shalt.err (!%p177_p9)
}
  0xdd   :  { %126 = dma.vmem_to_hbm [thread:$0]  %s121_s6, 256, %s257_s4, [#allocation4], %s194_s18, %s194_s18, %s195_s19  }
  0xde   :  { %191 = dma.done.wait [#allocation4], 256  }
  0xdf   :  { %192 = vsyncadd [#allocation4], 4294967040 }
  0xe0   :  { %130 = vsyncpa [#allocation3], 1 }
  0xe1   :  { %131 = vsyncpa [#allocation4], 1 }

</bundles_post_ra>
